<compile_context>
chip_gen: v7x
topology: tpu7x:2x2x1
jax: 0.10.0
libtpu: 0.0.40
codegen_flags: <defaults>
</compile_context>

<pallas_src>
import jax
import jax.numpy as jnp
from jax.experimental import pallas as pl
from jax.experimental.pallas import tpu as pltpu

_COMPUTE_DTYPE = jnp.float32   # keep f32: kernel is overhead/HBM bound, not MXU bound
_OUT_FEATURES = 10             # true module output width
_OUT_PAD = 128                 # lane-dense output width used only by the small-B path


def _round_up(x, m):
    return ((x + m - 1) // m) * m


def _num_tensorcores():
    """Best-effort count of TensorCores a Pallas 'parallel' grid axis can shard over."""
    try:
        kind = jax.devices()[0].device_kind.lower()
    except Exception:
        return 1
    for tag in ("v4", "v5p", "v7"):   # megacore / dual-TensorCore chips
        if tag in kind:
            return 2
    return 1


def g_m9_kernel(x_ref, w1_ref, b1_ref, w2_ref, b2_ref,
                w3_ref, b3_ref, w4_ref, b4_ref, o_ref):
    """fc1+ReLU -> fc2+ReLU -> fc3+ReLU -> fc4.

    Output width follows w4_ref / o_ref: 10 on the streaming (grid) path, 128
    lane-padded on the small-batch latency path."""
    cdt = _COMPUTE_DTYPE
    x = x_ref[...].astype(cdt)                                   # (B, 10)

    h = jnp.dot(x, w1_ref[...].astype(cdt),
                preferred_element_type=jnp.float32)
    h = jnp.maximum(h + b1_ref[...], 0.0)                        # (B, 100)

    h = jnp.dot(h.astype(cdt), w2_ref[...].astype(cdt),
                preferred_element_type=jnp.float32)
    h = jnp.maximum(h + b2_ref[...], 0.0)                        # (B, 100)

    h = jnp.dot(h.astype(cdt), w3_ref[...].astype(cdt),
                preferred_element_type=jnp.float32)
    h = jnp.maximum(h + b3_ref[...], 0.0)                        # (B, 50)

    y = jnp.dot(h.astype(cdt), w4_ref[...].astype(cdt),
                preferred_element_type=jnp.float32)
    y = y + b4_ref[...]                                          # (B, out_width)

    o_ref[...] = y.astype(o_ref.dtype)


def _choose_grid(B, num_cores, max_tile):
    """Pick (tile_rows, num_tiles): tile a multiple of 256 (full MXU M-passes),
    num_tiles a multiple of num_cores (balanced TensorCore split)."""
    max_tile = max(256, _round_up(max_tile, 256))
    nb = num_cores * max(1, pl.cdiv(pl.cdiv(B, max_tile), num_cores))
    tile = min(max_tile, _round_up(pl.cdiv(B, nb), 256))
    return tile, nb


def g_m9_forward(x, params, *, max_batch_tile=1024, num_tensorcores=None):
    """params = (w1, b1, w2, b2, w3, b3, w4, b4, w4_padded, b4_padded)."""
    w1, b1, w2, b2, w3, b3, w4, b4, w4p, b4p = params
    B, F_in = x.shape
    num_cores = int(num_tensorcores) if num_tensorcores else _num_tensorcores()

    # ---- Small-batch latency path: single TC, no grid, everything VMEM-resident,
    # lane-dense 128-wide store (unmasked vst), wrapper slices back to 10 cols. ----
    small_limit = max_batch_tile if num_cores == 1 else 256
    if B <= small_limit:
        out = pl.pallas_call(
            g_m9_kernel,
            out_shape=jax.ShapeDtypeStruct((B, _OUT_PAD), jnp.float32),
            in_specs=[pl.BlockSpec(memory_space=pltpu.MemorySpace.VMEM)] * 9,
            out_specs=pl.BlockSpec(memory_space=pltpu.MemorySpace.VMEM),
        )(x, w1, b1, w2, b2, w3, b3, w4p, b4p)
        return out[:, :_OUT_FEATURES]

    # ---- Streaming path: tile over batch. Weights/biases use a constant index_map so
    # they stay VMEM-resident across all tiles; only x / y stream from HBM. The true
    # 10-wide output is written directly (block last dim == full array dim -> legal;
    # masked vst beats 12.8x-inflated padded writes at these sizes). ----
    tile, nb = _choose_grid(B, num_cores, max_batch_tile)
    Bp = nb * tile
    if Bp != B:
        x = jnp.pad(x, ((0, Bp - B), (0, 0)))
    resident = lambda i: (0, 0)

    compiler_params = pltpu.CompilerParams(
        dimension_semantics=("parallel",),
        # Only needed once tiles grow past ~1024 rows (v5e's 16 MiB default scoped VMEM).
        vmem_limit_bytes=(32 * 1024 * 1024) if tile > 1024 else None,
    )

    out = pl.pallas_call(
        g_m9_kernel,
        out_shape=jax.ShapeDtypeStruct((Bp, _OUT_FEATURES), jnp.float32),
        grid=(nb,),
        in_specs=[
            pl.BlockSpec((tile, F_in), lambda i: (i, 0)),
            pl.BlockSpec(w1.shape, resident),
            pl.BlockSpec(b1.shape, resident),
            pl.BlockSpec(w2.shape, resident),
            pl.BlockSpec(b2.shape, resident),
            pl.BlockSpec(w3.shape, resident),
            pl.BlockSpec(b3.shape, resident),
            pl.BlockSpec(w4.shape, resident),
            pl.BlockSpec(b4.shape, resident),
        ],
        out_specs=pl.BlockSpec((tile, _OUT_FEATURES), lambda i: (i, 0)),
        compiler_params=compiler_params,
    )(x, w1, b1, w2, b2, w3, b3, w4, b4)
    return out[:B] if Bp != B else out


def _linear_init(key, fan_in, fan_out):
    # Mimics nn.Linear default init: U(-1/sqrt(fan_in), 1/sqrt(fan_in)).
    kw, kb = jax.random.split(key)
    bound = 1.0 / jnp.sqrt(float(fan_in))
    w = jax.random.uniform(kw, (fan_in, fan_out), jnp.float32, -bound, bound)
    b = jax.random.uniform(kb, (1, fan_out), jnp.float32, -bound, bound)
    return w, b


def init_params(key):
    k1, k2, k3, k4 = jax.random.split(key, 4)
    w1, b1 = _linear_init(k1, 10, 100)
    w2, b2 = _linear_init(k2, 100, 100)
    w3, b3 = _linear_init(k3, 100, 50)
    w4, b4 = _linear_init(k4, 50, _OUT_FEATURES)
    # Lane-dense final layer, used only by the small-batch path (zero columns produce
    # zero outputs that the wrapper slices away).
    w4p = jnp.zeros((50, _OUT_PAD), jnp.float32).at[:, :_OUT_FEATURES].set(w4)
    b4p = jnp.zeros((1, _OUT_PAD), jnp.float32).at[:, :_OUT_FEATURES].set(b4)
    return (w1, b1, w2, b2, w3, b3, w4, b4, w4p, b4p)


def _reference(x, raw):
    w1, b1, w2, b2, w3, b3, w4, b4 = raw
    h = jnp.maximum(x @ w1 + b1, 0.0)
    h = jnp.maximum(h @ w2 + b2, 0.0)
    h = jnp.maximum(h @ w3 + b3, 0.0)
    return h @ w4 + b4


if __name__ == "__main__":
    key = jax.random.PRNGKey(0)
    kx1, kx2, kx3, kp = jax.random.split(key, 4)
    params = init_params(kp)
    raw = params[:8]

    fwd = jax.jit(g_m9_forward,
                  static_argnames=("max_batch_tile", "num_tensorcores"))

    # 1) Small batch -> no-grid latency path (lane-dense padded store).
    x1 = jax.random.normal(kx1, (8, 10), jnp.float32)
    o1 = jax.block_until_ready(fwd(x1, params))
    r1 = _reference(x1, raw)
    assert o1.shape == (8, _OUT_FEATURES)
    assert jnp.allclose(o1, r1, atol=1e-4, rtol=1e-4)

    # 2) Large batch -> batch-tiled streaming path with default config
    #    (1536 rows -> 2 tiles of 768, no row padding, 10-wide direct output).
    x2 = jax.random.normal(kx2, (1536, 10), jnp.float32)
    o2 = jax.block_until_ready(fwd(x2, params))
    r2 = _reference(x2, raw)
    assert o2.shape == (1536, _OUT_FEATURES)
    assert jnp.allclose(o2, r2, atol=1e-4, rtol=1e-4)

    # 3) Ragged batch with a forced dual-TensorCore split: exercises the balanced
    #    nb=2 tiling, batch-row padding, and the trailing row slice.
    x3 = jax.random.normal(kx3, (600, 10), jnp.float32)
    o3 = jax.block_until_ready(fwd(x3, params, num_tensorcores=2))
    r3 = _reference(x3, raw)
    assert o3.shape == (600, _OUT_FEATURES)
    assert jnp.allclose(o3, r3, atol=1e-4, rtol=1e-4)

    print("KERNEL_OK")
</pallas_src>

<mosaic_0001>
module attributes {stable_mosaic.version = 11 : i64} {
  func.func @g_m9_kernel(%arg0: memref<8x10xf32, #tpu.memory_space<vmem>>, %arg1: memref<10x100xf32, #tpu.memory_space<vmem>>, %arg2: memref<1x100xf32, #tpu.memory_space<vmem>>, %arg3: memref<100x100xf32, #tpu.memory_space<vmem>>, %arg4: memref<1x100xf32, #tpu.memory_space<vmem>>, %arg5: memref<100x50xf32, #tpu.memory_space<vmem>>, %arg6: memref<1x50xf32, #tpu.memory_space<vmem>>, %arg7: memref<50x128xf32, #tpu.memory_space<vmem>>, %arg8: memref<1x128xf32, #tpu.memory_space<vmem>>, %arg9: memref<8x128xf32, #tpu.memory_space<vmem>>) attributes {dimension_semantics = [], scalar_prefetch = 0 : i64, scratch_operands = 0 : i64, tpu.core_type = #tpu.core_type<tc>} {
    %c0 = arith.constant 0 : index
    %c0_0 = arith.constant 0 : index
    %0 = vector.load %arg0[%c0, %c0_0] : memref<8x10xf32, #tpu.memory_space<vmem>>, vector<8x10xf32>
    %c0_1 = arith.constant 0 : index
    %c0_2 = arith.constant 0 : index
    %1 = vector.load %arg1[%c0_1, %c0_2] : memref<10x100xf32, #tpu.memory_space<vmem>>, vector<10x100xf32>
    %cst = arith.constant dense<0.000000e+00> : vector<8x100xf32>
    %2 = tpu.matmul %0, %1, %cst {dimension_numbers = #tpu.dot_dimension_numbers<[1], [0], [0], [1], [0, 0, 1, 1], [], []>} : vector<8x10xf32>, vector<10x100xf32>, vector<8x100xf32> -> vector<8x100xf32>
    %c0_3 = arith.constant 0 : index
    %c0_4 = arith.constant 0 : index
    %3 = vector.load %arg2[%c0_3, %c0_4] : memref<1x100xf32, #tpu.memory_space<vmem>>, vector<1x100xf32>
    %4 = vector.broadcast %3 : vector<1x100xf32> to vector<8x100xf32>
    %5 = arith.addf %2, %4 : vector<8x100xf32>
    %cst_5 = arith.constant 0.000000e+00 : f32
    %6 = vector.broadcast %cst_5 : f32 to vector<8x100xf32>
    %7 = arith.maximumf %5, %6 : vector<8x100xf32>
    %c0_6 = arith.constant 0 : index
    %c0_7 = arith.constant 0 : index
    %8 = vector.load %arg3[%c0_6, %c0_7] : memref<100x100xf32, #tpu.memory_space<vmem>>, vector<100x100xf32>
    %cst_8 = arith.constant dense<0.000000e+00> : vector<8x100xf32>
    %9 = tpu.matmul %7, %8, %cst_8 {dimension_numbers = #tpu.dot_dimension_numbers<[1], [0], [0], [1], [0, 0, 1, 1], [], []>} : vector<8x100xf32>, vector<100x100xf32>, vector<8x100xf32> -> vector<8x100xf32>
    %c0_9 = arith.constant 0 : index
    %c0_10 = arith.constant 0 : index
    %10 = vector.load %arg4[%c0_9, %c0_10] : memref<1x100xf32, #tpu.memory_space<vmem>>, vector<1x100xf32>
    %11 = vector.broadcast %10 : vector<1x100xf32> to vector<8x100xf32>
    %12 = arith.addf %9, %11 : vector<8x100xf32>
    %cst_11 = arith.constant 0.000000e+00 : f32
    %13 = vector.broadcast %cst_11 : f32 to vector<8x100xf32>
    %14 = arith.maximumf %12, %13 : vector<8x100xf32>
    %c0_12 = arith.constant 0 : index
    %c0_13 = arith.constant 0 : index
    %15 = vector.load %arg5[%c0_12, %c0_13] : memref<100x50xf32, #tpu.memory_space<vmem>>, vector<100x50xf32>
    %cst_14 = arith.constant dense<0.000000e+00> : vector<8x50xf32>
    %16 = tpu.matmul %14, %15, %cst_14 {dimension_numbers = #tpu.dot_dimension_numbers<[1], [0], [0], [1], [0, 0, 1, 1], [], []>} : vector<8x100xf32>, vector<100x50xf32>, vector<8x50xf32> -> vector<8x50xf32>
    %c0_15 = arith.constant 0 : index
    %c0_16 = arith.constant 0 : index
    %17 = vector.load %arg6[%c0_15, %c0_16] : memref<1x50xf32, #tpu.memory_space<vmem>>, vector<1x50xf32>
    %18 = vector.broadcast %17 : vector<1x50xf32> to vector<8x50xf32>
    %19 = arith.addf %16, %18 : vector<8x50xf32>
    %cst_17 = arith.constant 0.000000e+00 : f32
    %20 = vector.broadcast %cst_17 : f32 to vector<8x50xf32>
    %21 = arith.maximumf %19, %20 : vector<8x50xf32>
    %c0_18 = arith.constant 0 : index
    %c0_19 = arith.constant 0 : index
    %22 = vector.load %arg7[%c0_18, %c0_19] : memref<50x128xf32, #tpu.memory_space<vmem>>, vector<50x128xf32>
    %cst_20 = arith.constant dense<0.000000e+00> : vector<8x128xf32>
    %23 = tpu.matmul %21, %22, %cst_20 {dimension_numbers = #tpu.dot_dimension_numbers<[1], [0], [0], [1], [0, 0, 1, 1], [], []>} : vector<8x50xf32>, vector<50x128xf32>, vector<8x128xf32> -> vector<8x128xf32>
    %c0_21 = arith.constant 0 : index
    %c0_22 = arith.constant 0 : index
    %24 = vector.load %arg8[%c0_21, %c0_22] : memref<1x128xf32, #tpu.memory_space<vmem>>, vector<1x128xf32>
    %25 = vector.broadcast %24 : vector<1x128xf32> to vector<8x128xf32>
    %26 = arith.addf %23, %25 : vector<8x128xf32>
    %c0_23 = arith.constant 0 : index
    %c0_24 = arith.constant 0 : index
    %27 = vector.load %arg9[%c0_23, %c0_24] : memref<8x128xf32, #tpu.memory_space<vmem>>, vector<8x128xf32>
    tpu.vector_store %arg9[%c0_23, %c0_24], %26 {strides = array<i32>} : memref<8x128xf32, #tpu.memory_space<vmem>>, vector<8x128xf32>,
    return
  }
}

</mosaic_0001>

<bundles_post_ra>
// kernel: g_m9_forward.1
= control target key start
LH: loop header
LB: loop body
LE: loop exit
PB: predicated region body
PF: predicated region fallthrough
CT: control target
= control target key end

     0   :  { %14 = vsyncpa [#allocation3], 0  ;;  %s906_s0 = inlined_call_operand.vmem [shape: f32[8,10], index: 0, kind: input, shape index: {}]   ;;  %s907_s1 = inlined_call_operand.hbm [shape: f32[10,100], index: 1, kind: input, shape index: {}]   ;;  %s908_s2 = inlined_call_operand.vmem [shape: f32[1,100], index: 2, kind: input, shape index: {}]   ;;  %s909_s3 = inlined_call_operand.vmem [shape: f32[100,100], index: 3, kind: input, shape index: {}]   ;;  %s910_s4 = inlined_call_operand.vmem [shape: f32[1,100], index: 4, kind: input, shape index: {}]   ;;  %s911_s5 = inlined_call_operand.vmem [shape: f32[100,50], index: 5, kind: input, shape index: {}]   ;;  %s912_s6 = inlined_call_operand.vmem [shape: f32[1,50], index: 6, kind: input, shape index: {}]   ;;  %s913_s7 = inlined_call_operand.vmem [shape: f32[50,128], index: 7, kind: input, shape index: {}]   ;;  %s914_s8 = inlined_call_operand.vmem [shape: f32[1,128], index: 8, kind: input, shape index: {}]   ;;  %s915_s9 = inlined_call_operand.hbm [shape: f32[8,128], index: 9, kind: output, shape index: {}]  }
   0x1   :  { %15 = vsyncpa [#allocation4], 0  ;;  %s677_s30 = smov [#allocation2]   ;;  %s629_s13 = scalar_lea.hbm %s907_s1, 256 }
   0x2   :  { %s23_s10 = sshll.u32 %s677_s30, 4  ;;  %p630_p0 = scmp.ne.s32.totalorder %s907_s1, %s629_s13  ;;  %s24_s10 = int_to_ptr.vmem [resolvable:$true] %s23_s10 }
   0x3   :  { %p633_p1 = scmp.lt.u32.totalorder %s629_s13, %s907_s1 }
   0x5   :  { %p635_p2 = pnand %p633_p1, %p630_p0 }
   0x7   :  { %638 = shalt.err (!%p635_p2)
}
   0x8   :  { %s639_s18 = scalar_lea.vmem %s24_s10, 256  ;;  %p644_p4 = scmp.lt.s32.totalorder %s24_s10, %s24_s10 }
   0x9   :  { %p640_p3 = scmp.ne.s32.totalorder %s24_s10, %s639_s18  ;;  %p645_p5 = scmp.lt.s32.totalorder %s639_s18, %s639_s18 }
   0xb   :  { %p646_p6 = por %p645_p5, %p644_p4 }
   0xd   :  { %p647_p7 = pnand %p646_p6, %p640_p3 }
   0xf   :  { %650 = shalt.err (!%p647_p7)
}
  0x10   :  { %s678_s19 = smov 128   ;;  %s679_s20 = smov 8  }
  0x11   :  { %29 = dma.hbm_to_vmem [thread:$0]  %s907_s1, 256, %s24_s10, [#allocation3], %s678_s19, %s678_s19, %s679_s20  }
  0x12   :  { %673 = dma.done.wait [#allocation3], 256  }
  0x13   :  { %674 = vsyncadd [#allocation3], 4294967040  ;;  %v680_v0 = vmov 0.0|0.0   ;;  %vm681_vm0 = vmmov 0   ;;  %v682_v1 = vmov 0.0   ;;  %vm61_vm1 = vcmask 1041408  }
  0x14   :  { %572 = vmatprep.subr.bf16.mxu0 %v680_v0  ;;  %576 = vmatprep.subr.bf16.mxu1 %v680_v0  ;;  %v48_v2 = vld [vmem:[#allocation2] sm:$0xff]  ;;  %v49_v3 = vld [vmem:[#allocation2 + $0x8] sm:$0x3]  ;;  %vm683_vm2 = vmmov 1   ;;  %v138_v7 = vld [vmem:[%s909_s3 + $0x10] sm:$0xff]  ;;  %vm57_vm4 = vcmask 80896  }
  0x15   :  { %494 = vmatprep.mubr.msk.f32.mxu0 %vm681_vm0, %v682_v1  ;;  %523 = vmatprep.mubr.msk.f32.mxu1 %vm681_vm0, %v682_v1  ;;  %vm574_vm3 = vmpackc.low %vm61_vm1, %vm683_vm2  ;;  %v573_v4 = vpack.c.bf16 %v49_v3, %v48_v2  ;;  %v136_v5 = vld [vmem:[%s909_s3] sm:$0xff]  ;;  %v137_v6 = vld [vmem:[%s909_s3 + $0x8] sm:$0xff]  ;;  %vm160_vm5 = vcmask 1043456   ;;  %vm156_vm6 = vcmask 818176   ;;  %vm346_vm7 = vcmask 408576   ;;  %s684_s24 = smov [#allocation5]  }
  0x16   :  { %v577_v8 = vpack.c.bf16 %v137_v6, %v136_v5  ;;  %v139_v9 = vld [vmem:[%s909_s3 + $0x18] sm:$0xff]  ;;  %v47_v10 = vld [vmem:[%s906_s0] sm:$0xff]  ;;  %v141_v13 = vld [vmem:[%s909_s3 + $0x28] sm:$0xff]  ;;  %s430_s25 = sshll.u32 %s684_s24, 4  ;;  %s431_s25 = int_to_ptr.vmem [resolvable:$true] %s430_s25 }
  0x17   :  { %575 = vmatpush3.bf16.msk.msra.mxu0 %vm574_vm3, %v573_v4  ;;  %v580_v11 = vpack.c.bf16 %v139_v9, %v138_v7  ;;  %v140_v12 = vld [vmem:[%s909_s3 + $0x20] sm:$0xff]  ;;  %v142_v15 = vld [vmem:[%s909_s3 + $0x30] sm:$0xff]  ;;  %v143_v16 = vld [vmem:[%s909_s3 + $0x38] sm:$0xff]  ;;  %p656_p9 = scmp.lt.s32.totalorder %s431_s25, %s431_s25 }
  0x18   :  { %578 = vmatpush3.bf16.msra.mxu1 %v577_v8  ;;  %594 = vmatprep.subr.bf16.mxu0 %v680_v0  ;;  %v583_v14 = vpack.c.bf16 %v141_v13, %v140_v12  ;;  %v586_v17 = vpack.c.bf16 %v143_v16, %v142_v15  ;;  %v144_v18 = vld [vmem:[%s909_s3 + $0x40] sm:$0xff]  ;;  %v145_v19 = vld [vmem:[%s909_s3 + $0x48] sm:$0xff]  ;;  %v146_v21 = vld [vmem:[%s909_s3 + $0x50] sm:$0xff] }
  0x19   :  { %579 = vmatprep.subr.bf16.mxu1 %v680_v0  ;;  %v589_v20 = vpack.c.bf16 %v145_v19, %v144_v18  ;;  %v147_v22 = vld [vmem:[%s909_s3 + $0x58] sm:$0xff]  ;;  %v148_v24 = vld [vmem:[%s909_s3 + $0x60] sm:$0xf]  ;;  %v236_v26 = vld [vmem:[%s911_s5 + $0x8] sm:$0xff] }
  0x1a   :  { %495 = vmatmul.mubr.msk.f32.vlgmr.msra.gmra.mrb[0].mxu0 %vm57_vm4, %v47_v10  ;;  %v592_v23 = vpack.c.bf16 %v147_v22, %v146_v21  ;;  %v235_v25 = vld [vmem:[%s911_s5] sm:$0xff]  ;;  %v237_v27 = vld [vmem:[%s911_s5 + $0x10] sm:$0xff]  ;;  %v238_v29 = vld [vmem:[%s911_s5 + $0x18] sm:$0xff] }
  0x1b   :  { %552 = vmatprep.mubr.msk.f32.mxu0 %vm681_vm0, %v682_v1  ;;  %v595_v28 = vpack.c.bf16 %v236_v26, %v235_v25  ;;  %v598_v30 = vpack.c.bf16 %v238_v29, %v237_v27  ;;  %v239_v31 = vld [vmem:[%s911_s5 + $0x20] sm:$0xff]  ;;  %v240_v32 = vld [vmem:[%s911_s5 + $0x28] sm:$0xff]  ;;  %v241_v34 = vld [vmem:[%s911_s5 + $0x30] sm:$0xff] }
  0x1c   :  { %581 = vmatpush3.bf16.msra.mxu1 %v580_v11  ;;  %v601_v33 = vpack.c.bf16 %v240_v32, %v239_v31  ;;  %v242_v35 = vld [vmem:[%s911_s5 + $0x38] sm:$0xff]  ;;  %v243_v37 = vld [vmem:[%s911_s5 + $0x40] sm:$0xff]  ;;  %v244_v38 = vld [vmem:[%s911_s5 + $0x48] sm:$0xff] }
  0x1d   :  { %582 = vmatprep.subr.bf16.mxu1 %v680_v0  ;;  %596 = vmatpush3.bf16.msra.mxu0 %v595_v28  ;;  %v604_v36 = vpack.c.bf16 %v242_v35, %v241_v34  ;;  %v607_v39 = vpack.c.bf16 %v244_v38, %v243_v37  ;;  %v439_v40 = vld [vmem:[%s908_s2] ss:$0 sm:$0xff]  ;;  %v245_v45 = vld [vmem:[%s911_s5 + $0x50] sm:$0xff]  ;;  %v246_v46 = vld [vmem:[%s911_s5 + $0x58] sm:$0xff] }
  0x1e   :  { %597 = vmatprep.subr.bf16.mxu0 %v680_v0  ;;  %v610_v47 = vpack.c.bf16 %v246_v46, %v245_v45  ;;  %v247_v48 = vld [vmem:[%s911_s5 + $0x60] sm:$0xf]  ;;  %v333_v50 = vld [vmem:[%s913_s7 + $0x8] sm:$0xff]  ;;  %v334_v51 = vld [vmem:[%s913_s7 + $0x10] sm:$0xff] }
  0x1f   :  { %v332_v49 = vld [vmem:[%s913_s7] sm:$0xff]  ;;  %v335_v53 = vld [vmem:[%s913_s7 + $0x18] sm:$0xff]  ;;  %v337_v61 = vld [vmem:[%s913_s7 + $0x28] sm:$0xff] }
  0x20   :  { %584 = vmatpush3.bf16.msra.mxu1 %v583_v14  ;;  %v613_v52 = vpack.c.bf16 %v333_v50, %v332_v49  ;;  %v616_v54 = vpack.c.bf16 %v335_v53, %v334_v51  ;;  %v442_v55 = vld [vmem:[%s910_s4] ss:$0 sm:$0xff]  ;;  %v338_v63 = vld [vmem:[%s913_s7 + $0x30] sm:$0x3] }
  0x21   :  { %585 = vmatprep.subr.bf16.mxu1 %v680_v0  ;;  %599 = vmatpush3.bf16.msra.mxu0 %v598_v30  ;;  %v336_v60 = vld [vmem:[%s913_s7 + $0x20] sm:$0xff]  ;;  %s651_s7 = scalar_lea.vmem %s431_s25, 128 }
  0x22   :  { %600 = vmatprep.subr.bf16.mxu0 %v680_v0  ;;  %v619_v62 = vpack.c.bf16 %v337_v61, %v336_v60  ;;  %p652_p8 = scmp.ne.s32.totalorder %s431_s25, %s651_s7  ;;  %p657_p10 = scmp.lt.s32.totalorder %s651_s7, %s651_s7 }
  0x24   :  { %587 = vmatpush3.bf16.msra.mxu1 %v586_v17  ;;  %p658_p11 = por %p657_p10, %p656_p9 }
  0x25   :  { %588 = vmatprep.subr.bf16.mxu1 %v680_v0  ;;  %602 = vmatpush3.bf16.msra.mxu0 %v601_v33 }
  0x26   :  { %603 = vmatprep.subr.bf16.mxu0 %v680_v0  ;;  %p659_p12 = pnand %p658_p11, %p652_p8 }
  0x28   :  { %590 = vmatpush3.bf16.msra.mxu1 %v589_v20 }
  0x29   :  { %591 = vmatprep.subr.bf16.mxu1 %v680_v0  ;;  %605 = vmatpush3.bf16.msra.mxu0 %v604_v36 }
  0x2a   :  { %606 = vmatprep.subr.bf16.mxu0 %v680_v0 }
  0x2c   :  { %593 = vmatpush3.bf16.msra.mxu1 %v592_v23 }
  0x2d   :  { %521 = vmatprep.subr.mxu1 %v682_v1  ;;  %608 = vmatpush3.bf16.msra.mxu0 %v607_v39 }
  0x2e   :  { %609 = vmatprep.subr.bf16.mxu0 %v680_v0 }
  0x30   :  { %522 = vmatpush3.msk.msra.mxu1 %vm160_vm5, %v148_v24 }
  0x31   :  { %612 = vmatprep.subr.bf16.mxu1 %v680_v0  ;;  %611 = vmatpush3.bf16.msra.mxu0 %v610_v47 }
  0x32   :  { %550 = vmatprep.subr.mxu0 %v682_v1 }
  0x35   :  { %551 = vmatpush3.msk.msra.mxu0 %vm160_vm5, %v247_v48 }
  0xed   :  { %v131_v41 = vpop.f32.mrb[0].mxu0 }
  0xee   :  { %v132_v42 = vadd.f32 %v439_v40, %v131_v41  ;;  %v496_v43 = vpop.f32.mrb[1].mxu0 }
  0xf0   :  { %v135_v44 = vmax.f32 %v132_v42, 0.0 }
  0xf2   :  { %524 = vmatmul.mubr.msk.f32.vlgmr.msra.gmra.mrb[0].mxu1 %vm156_vm6, %v135_v44 }
  0xf3   :  { %569 = vmatprep.mubr.msk.f32.mxu1 %vm681_vm0, %v682_v1  ;;  %614 = vmatpush3.bf16.msra.mxu1 %v613_v52 }
  0xf4   :  { %615 = vmatprep.subr.bf16.mxu1 %v680_v0 }
  0xf7   :  { %617 = vmatpush3.bf16.msra.mxu1 %v616_v54 }
  0xf8   :  { %618 = vmatprep.subr.bf16.mxu1 %v680_v0  ;;  %v445_v0 = vld [vmem:[%s912_s6] ss:$0 sm:$0xff] }
  0xfb   :  { %620 = vmatpush3.bf16.msra.mxu1 %v619_v62 }
  0xfc   :  { %567 = vmatprep.subr.mxu1 %v682_v1  ;;  %v448_v1 = vld [vmem:[%s914_s8] ss:$0 sm:$0xff] }
  0xff   :  { %568 = vmatpush3.msk.msra.mxu1 %vm61_vm1, %v338_v63 }
 0x1c5   :  { %v230_v56 = vpop.f32.mrb[0].mxu1 }
 0x1c6   :  { %v231_v57 = vadd.f32 %v442_v55, %v230_v56  ;;  %v525_v58 = vpop.f32.mrb[1].mxu1 }
 0x1c8   :  { %v234_v59 = vmax.f32 %v231_v57, 0.0 }
 0x1ca   :  { %553 = vmatmul.mubr.msk.f32.vlgmr.msra.gmra.mrb[2].mxu0 %vm156_vm6, %v234_v59 }
 0x29d   :  { %v327_v2 = vpop.f32.mrb[2].mxu0 }
 0x29e   :  { %v328_v3 = vadd.f32 %v445_v0, %v327_v2  ;;  %v554_v4 = vpop.f32.mrb[3].mxu0 }
 0x2a0   :  { %v331_v5 = vmax.f32 %v328_v3, 0.0 }
 0x2a2   :  { %570 = vmatmul.mubr.msk.f32.vlgmr.msra.gmra.mrb[2].mxu1 %vm346_vm7, %v331_v5 }
 0x375   :  { %v419_v6 = vpop.f32.mrb[2].mxu1 }
 0x376   :  { %v420_v7 = vadd.f32 %v448_v1, %v419_v6  ;;  %v571_v8 = vpop.f32.mrb[3].mxu1 }
 0x378   :  { %423 = vst [vmem:[#allocation5] sm:$0xff] %v420_v7 }
 0x379   :  { %662 = shalt.err (!%p659_p12)
}
 0x37a   :  { %s663_s27 = scalar_lea.hbm %s915_s9, 128 }
 0x37b   :  { %p664_p13 = scmp.ne.s32.totalorder %s915_s9, %s663_s27  ;;  %p667_p0 = scmp.lt.u32.totalorder %s663_s27, %s915_s9 }
 0x37d   :  { %p669_p1 = pnand %p667_p0, %p664_p13 }
 0x37f   :  { %672 = shalt.err (!%p669_p1)
}
 0x380   :  { %433 = dma.vmem_to_hbm [thread:$0]  %s431_s25, 128, %s915_s9, [#allocation4]  }
 0x381   :  { %675 = dma.done.wait [#allocation4], 128  }
 0x382   :  { %676 = vsyncadd [#allocation4], 4294967168 }
 0x383   :  { %437 = vsyncpa [#allocation3], 1 }
 0x384   :  { %438 = vsyncpa [#allocation4], 1 }

</bundles_post_ra>
